<compile_context>
chip_gen: v7x
topology: tpu7x:2x2x1
jax: 0.10.0
libtpu: 0.0.40
codegen_flags: <defaults>
</compile_context>

<pallas_src>
import functools
import math

import jax
import jax.numpy as jnp
from jax.experimental import pallas as pl
from jax.experimental.pallas import tpu as pltpu


_LANE = 128          # lane width / lane-chunk size
_UNROLL_CAP = 64     # max number of 128-lane chunks unrolled per block


def _round_up(v, m):
    return ((v + m - 1) // m) * m


def _cdiv(a, b):
    return -(-a // b)


def _vmem_budgets():
    """(per-input-block bytes, intermediate bytes, vmem_limit_bytes)."""
    mib = 1024 * 1024
    vmem = None
    try:
        vmem = getattr(pltpu.get_tpu_info(), "vmem_capacity_bytes", None)
    except Exception:
        vmem = None
    if vmem is None:
        # Unknown generation: conservative, safe everywhere.
        return 8 * mib, 6 * mib, 32 * mib
    if vmem >= 96 * mib:
        # v5e / v6e class: 128 MiB physical VMEM -> big blocks, raised limit.
        return 16 * mib, 12 * mib, 64 * mib
    # v7x class: 64 MiB per TensorCore -> keep double-buffered footprint small,
    # but still prefer the larger end (HBM ~3.2 TB/s makes per-step overhead
    # relatively bigger).
    return 12 * mib, 8 * mib, 40 * mib


def _lane_partials(x, acc_dtype, kb):
    """(tm, kb) -> (tm, 128) running sum via pure VPU adds (kb % 128 == 0)."""
    acc = x[:, :_LANE].astype(acc_dtype)
    for c in range(1, kb // _LANE):
        acc = acc + x[:, c * _LANE:(c + 1) * _LANE].astype(acc_dtype)
    return acc


def _row_sum_full_k_kernel(x_ref, o_ref, *, acc_dtype):
    # x_ref: (tm, K) block; o_ref: (1, tm) lane-dense row of per-row sums.
    x = x_ref[...]
    kb = x.shape[-1]
    if kb % _LANE == 0 and _LANE < kb <= _UNROLL_CAP * _LANE:
        acc = _lane_partials(x, acc_dtype, kb)      # VPU adds only
        s = jnp.sum(acc, axis=-1)                   # single XLU reduce
    else:
        s = jnp.sum(x.astype(acc_dtype), axis=-1)
    o_ref[...] = s.reshape(1, -1).astype(o_ref.dtype)


def _row_sum_k_tiled_kernel(x_ref, o_ref, acc_ref, *, acc_dtype, k_total, tk,
                            need_mask):
    # Streaming K-tiled reduce with a lane-wide (tm, 128) accumulator.
    k_idx = pl.program_id(1)
    nk = pl.num_programs(1)

    @pl.when(k_idx == 0)
    def _():
        acc_ref[...] = jnp.zeros_like(acc_ref)

    if need_mask:
        # Unmasked fast path for every K step but the last.
        @pl.when(k_idx < nk - 1)
        def _():
            acc_ref[...] += _lane_partials(x_ref[...], acc_dtype, tk)

        # Mask out-of-bounds columns only on the final (partial) K step.
        @pl.when(k_idx == nk - 1)
        def _():
            x = x_ref[...]
            col = jax.lax.broadcasted_iota(jnp.int32, x.shape, 1) + k_idx * tk
            x = jnp.where(col < k_total, x, jnp.zeros_like(x))
            acc_ref[...] += _lane_partials(x, acc_dtype, tk)
    else:
        acc_ref[...] += _lane_partials(x_ref[...], acc_dtype, tk)

    @pl.when(k_idx == nk - 1)
    def _():
        s = jnp.sum(acc_ref[...], axis=-1)          # one cross-lane reduce
        o_ref[...] = s.reshape(1, -1).astype(o_ref.dtype)


def _sum_spike_layer_impl(x: jax.Array, *, force_k_tiled: bool = False,
                          force_tk=None) -> jax.Array:
    """Equivalent of _sumSpikeLayer.forward: sum over dims [2, ..., ndim-1]."""
    if x.ndim < 2:
        raise ValueError("expected at least 2-D input (N, C, ...)")
    N, C = x.shape[0], x.shape[1]
    rest = x.shape[2:]
    if len(rest) == 0:
        # TODO(synk): torch.sum with an empty dim list is ambiguous across
        # torch versions; keep identity behaviour for 2-D inputs.
        return x

    if jnp.issubdtype(x.dtype, jnp.floating):
        acc_dtype, out_dtype = jnp.float32, x.dtype
    else:
        # TODO(synk): torch promotes bool/uint8 sums to int64; int32 (TPU
        # native) is used here and is exact for realistic 0/1 spike counts.
        acc_dtype, out_dtype = jnp.int32, jnp.int32

    M = N * C
    K = math.prod(rest)
    if M == 0 or K == 0:
        return jnp.zeros((N, C), dtype=out_dtype)

    x2 = x.reshape(M, K)                            # no pad, no HBM copy pass
    itemsize = jnp.dtype(x.dtype).itemsize
    acc_item = jnp.dtype(acc_dtype).itemsize
    out_item = jnp.dtype(out_dtype).itemsize
    sub = {1: 32, 2: 16}.get(itemsize, 8)           # sublane multiple per dtype

    in_budget, interm_budget, vmem_limit = _vmem_budgets()
    cost = pl.CostEstimate(
        flops=M * K,
        transcendentals=0,
        bytes_accessed=M * K * itemsize + M * out_item,
    )

    # ---------------- full-K (single-pass) path sizing ----------------------
    chunkable = (K % _LANE == 0) and (_LANE < K) and (K // _LANE <= _UNROLL_CAP)
    if chunkable or jnp.dtype(x.dtype) == jnp.dtype(acc_dtype):
        interm_per_row = _LANE * acc_item           # (tm, 128) running sum
    else:
        interm_per_row = max(K, _LANE) * acc_item   # worst-case upcast copy
    rows_fit = min(in_budget // max(1, K * itemsize),
                   interm_budget // max(1, interm_per_row))
    rows_fit = (rows_fit // sub) * sub

    use_full_k = (rows_fit >= sub) and not force_k_tiled
    tm = 0
    if use_full_k:
        m_ceil = _round_up(M, sub)
        tm = min(m_ceil, rows_fit)
        if tm >= _LANE:
            tm = (tm // _LANE) * _LANE              # lane-dense (1, tm) stores
        num_row_tiles = _cdiv(M, tm)
        # v7x megacore: give both TensorCores work when there is enough of it.
        if num_row_tiles == 1 and M > _LANE and M * K * itemsize >= (1 << 20):
            half_align = _LANE if M >= 2 * _LANE else sub
            tm = _round_up(_cdiv(M, 2), half_align)
            num_row_tiles = _cdiv(M, tm)
        # Small-M / large-K: a 1-3 step grid cannot pipeline the big full-K
        # DMA; switch to K-tiled streaming instead.
        if num_row_tiles <= 3 and tm * K * itemsize >= (2 << 20) and K >= 4 * _LANE:
            use_full_k = False

    if use_full_k:
        num_row_tiles = _cdiv(M, tm)
        out = pl.pallas_call(
            functools.partial(_row_sum_full_k_kernel, acc_dtype=acc_dtype),
            out_shape=jax.ShapeDtypeStruct((num_row_tiles, tm), out_dtype),
            grid_spec=pltpu.PrefetchScalarGridSpec(
                num_scalar_prefetch=0,
                grid=(num_row_tiles,),
                in_specs=[pl.BlockSpec((tm, K), lambda i: (i, 0))],
                out_specs=pl.BlockSpec((1, tm), lambda i: (i, 0)),
            ),
            compiler_params=pltpu.CompilerParams(
                dimension_semantics=("parallel",),
                vmem_limit_bytes=vmem_limit,
            ),
            cost_estimate=cost,
        )(x2)
    else:
        # ---------------- K-tiled streaming path ----------------------------
        if M >= _LANE:
            tm = min(512, _round_up(M, _LANE))      # big, lane-dense row tiles
        else:
            tm = _round_up(M, sub)
        if _cdiv(M, tm) < 2 and M > _LANE:
            # >= 2 tiles on the parallel row axis keeps both v7x TCs busy.
            tm = _round_up(_cdiv(M, 2), _LANE if M >= 2 * _LANE else sub)
        tk = (in_budget // max(1, tm * itemsize)) // _LANE * _LANE
        tk = max(_LANE, min(tk, _UNROLL_CAP * _LANE, _round_up(K, _LANE)))
        if K > 4 * _LANE:
            # Keep at least ~4 K steps so the HBM DMA pipeline stays full.
            tk = min(tk, max(_LANE, _round_up(_cdiv(K, 4), _LANE)))
        if force_tk is not None:
            tk = int(force_tk)
        num_row_tiles = _cdiv(M, tm)
        num_k_tiles = _cdiv(K, tk)
        need_mask = (K % tk) != 0
        out = pl.pallas_call(
            functools.partial(_row_sum_k_tiled_kernel, acc_dtype=acc_dtype,
                              k_total=K, tk=tk, need_mask=need_mask),
            out_shape=jax.ShapeDtypeStruct((num_row_tiles, tm), out_dtype),
            grid_spec=pltpu.PrefetchScalarGridSpec(
                num_scalar_prefetch=0,
                grid=(num_row_tiles, num_k_tiles),
                in_specs=[pl.BlockSpec((tm, tk), lambda i, k: (i, k))],
                out_specs=pl.BlockSpec((1, tm), lambda i, k: (i, 0)),
                scratch_shapes=[pltpu.VMEM((tm, _LANE), acc_dtype)],
            ),
            compiler_params=pltpu.CompilerParams(
                dimension_semantics=("parallel", "arbitrary"),
                vmem_limit_bytes=vmem_limit,
            ),
            cost_estimate=cost,
        )(x2)

    # Rows >= M in the last (partial) row tile are unspecified; slice them off.
    return out.reshape(-1)[:M].reshape(N, C)


sum_spike_layer = jax.jit(_sum_spike_layer_impl,
                          static_argnames=("force_k_tiled", "force_tk"))


if __name__ == "__main__":
    key = jax.random.PRNGKey(0)

    # Primary (full-K streaming) path: (N, C, H, W) = (2, 4, 16, 16).
    x = jax.random.normal(key, (2, 4, 16, 16), dtype=jnp.float32)
    y = sum_spike_layer(x)
    jax.block_until_ready(y)
    y_ref = jnp.sum(x, axis=tuple(range(2, x.ndim)))
    assert y.shape == (2, 4), y.shape
    assert jnp.allclose(y, y_ref, atol=1e-4, rtol=1e-4), "full-K path mismatch"

    k1, k2 = jax.random.split(key)

    # K-tiled streaming path (no column masking): K = 384 = 3 * tk.
    xb = jax.random.normal(k1, (2, 4, 8, 48), dtype=jnp.float32)
    yb = _sum_spike_layer_impl(xb, force_k_tiled=True, force_tk=128)
    jax.block_until_ready(yb)
    yb_ref = jnp.sum(xb, axis=(2, 3))
    assert jnp.allclose(yb, yb_ref, atol=1e-4, rtol=1e-4), "k-tiled mismatch"

    # K-tiled streaming path with a partial (masked) final K tile: K = 300.
    xc = jax.random.normal(k2, (2, 4, 10, 30), dtype=jnp.float32)
    yc = _sum_spike_layer_impl(xc, force_k_tiled=True, force_tk=128)
    jax.block_until_ready(yc)
    yc_ref = jnp.sum(xc, axis=(2, 3))
    assert jnp.allclose(yc, yc_ref, atol=1e-4, rtol=1e-4), "masked k-tiled mismatch"

    print("KERNEL_OK")
</pallas_src>

<mosaic_0001>
module attributes {stable_mosaic.version = 11 : i64} {
  func.func @_row_sum_full_k_kernel(%arg0: i32, %arg1: memref<8x256xf32, #tpu.memory_space<vmem>>, %arg2: memref<1x8xf32, #tpu.memory_space<vmem>>) attributes {dimension_semantics = [#tpu.dimension_semantics<parallel>], iteration_bounds = array<i64: 1>, scalar_prefetch = 0 : i64, scratch_operands = 0 : i64, tpu.core_type = #tpu.core_type<tc>, window_params = [{transform_indices = @transform_0, window_bounds = array<i64: 8, 256>}, {transform_indices = @transform_1, window_bounds = array<i64: 1, 8>}]} {
    %c0 = arith.constant 0 : index
    %c0_0 = arith.constant 0 : index
    %0 = vector.load %arg1[%c0, %c0_0] : memref<8x256xf32, #tpu.memory_space<vmem>>, vector<8x256xf32>
    %1 = vector.extract_strided_slice %0 {offsets = [0, 0], sizes = [8, 128], strides = [1, 1]} : vector<8x256xf32> to vector<8x128xf32>
    %2 = vector.extract_strided_slice %0 {offsets = [0, 128], sizes = [8, 128], strides = [1, 1]} : vector<8x256xf32> to vector<8x128xf32>
    %3 = arith.addf %1, %2 : vector<8x128xf32>
    %cst = arith.constant dense<0.000000e+00> : vector<8xf32>
    %4 = vector.multi_reduction <add>, %3, %cst [1] : vector<8x128xf32> to vector<8xf32>
    %5 = vector.shape_cast %4 : vector<8xf32> to vector<1x8xf32>
    %c0_1 = arith.constant 0 : index
    %c0_2 = arith.constant 0 : index
    %6 = vector.load %arg2[%c0_1, %c0_2] : memref<1x8xf32, #tpu.memory_space<vmem>>, vector<1x8xf32>
    tpu.vector_store %arg2[%c0_1, %c0_2], %5 {strides = array<i32>} : memref<1x8xf32, #tpu.memory_space<vmem>>, vector<1x8xf32>,
    return
  }
  func.func @transform_0(%arg0: i32) -> (i32, i32) {
    %c0_i32 = arith.constant 0 : i32
    %c0_i32_0 = arith.constant 0 : i32
    return %arg0, %c0_i32 : i32, i32
  }
  func.func @transform_1(%arg0: i32) -> (i32, i32) {
    %c0_i32 = arith.constant 0 : i32
    %c0_i32_0 = arith.constant 0 : i32
    return %arg0, %c0_i32 : i32, i32
  }
}

</mosaic_0001>

<bundles_post_ra>
// kernel: _sum_spike_layer_impl.1
= control target key start
LH: loop header
LB: loop body
LE: loop exit
PB: predicated region body
PF: predicated region fallthrough
CT: control target
= control target key end

     0   :  { %v14_v3 = vlaneseq  ;;  %vm21_vm0 = vcmask 57344   ;;  %s46_s0 = inlined_call_operand.vmem [shape: f32[8,256], index: 0, kind: input, shape index: {}]   ;;  %s47_s1 = inlined_call_operand.vmem [shape: f32[1,8], index: 1, kind: output, shape index: {}]  }
   0x1   :  { %v8_v0 = vld [vmem:[%s46_s0] sm:$0xff]  ;;  %v9_v1 = vld [vmem:[%s46_s0 + $0x8] sm:$0xff] }
   0x2   :  { %v10_v2 = vadd.f32 %v9_v1, %v8_v0  ;;  %v15_v4 = vand.u32 127, %v14_v3  ;;  %v17_v5 = vshrl.u32 %v14_v3, 7 }
   0x4   :  { %11 = vadd.xlane.f32.xlu0 %v10_v2  ;;  %v18_v6 = vsub.s32 %v15_v4, %v17_v5 }
  0x91   :  { %v12_v7 = vpop.xlane.xlu0 %11 }
  0x92   :  { %v19_v8 = vrot.slane %v12_v7, %v18_v6 }
  0x94   :  { %22 = vst.msk [vmem:[%s47_s1] sm:$0x1] %vm21_vm0, %v19_v8 }

</bundles_post_ra>
